<compile_context>
chip_gen: v5e
topology: v5e:2x2
jax: 0.10.0
libtpu: 0.0.40
codegen_flags: <defaults>
</compile_context>

<pallas_src>
import jax
import jax.numpy as jnp
from jax.experimental import pallas as pl
from jax.experimental.pallas import tpu as pltpu

LANE = 128             # TPU lane width (last dim)
SUBLANE = 8            # f32 sublane count
MAX_BLOCK_ROWS = 4096  # 4096 * 128 * 4 B = 2 MiB per input tile
NUM_CORES = 2          # leading "parallel" axis (v7x megacore); harmless on 1-TC chips


def _sqdiff_kernel(a_ref, b_ref, o_ref, acc_ref):
    """Accumulate (a-b)^2 elementwise into a VMEM tile; reduce once at the end."""
    i = pl.program_id(1)

    @pl.when(i == 0)
    def _():
        acc_ref[...] = jnp.zeros_like(acc_ref)

    d = a_ref[...].astype(jnp.float32) - b_ref[...].astype(jnp.float32)
    acc_ref[...] += d * d  # pure VPU in the steady state

    @pl.when(i == pl.num_programs(1) - 1)
    def _():
        # Single cross-lane/sublane reduction per core per call; place the
        # scalar at (0, 0) of a full (8, 128) tile via one unmasked store.
        total = jnp.sum(acc_ref[...])
        r = jax.lax.broadcasted_iota(jnp.int32, o_ref.shape, 0)
        c = jax.lax.broadcasted_iota(jnp.int32, o_ref.shape, 1)
        o_ref[...] = jnp.where((r == 0) & (c == 0), total, jnp.float32(0.0))


def _round_up(x, m):
    return ((x + m - 1) // m) * m


def _sqdiff_sum_pallas(pa, pb):
    """sum((pa - pb)^2) for one parameter pair via a tiled Pallas reduction."""
    a = jnp.ravel(pa).astype(jnp.float32)
    b = jnp.ravel(pb).astype(jnp.float32)
    n = a.shape[0]

    rows_needed = -(-n // LANE)
    block_rows = min(MAX_BLOCK_ROWS, _round_up(rows_needed, SUBLANE))
    rows = _round_up(rows_needed, NUM_CORES * block_rows)
    pad = rows * LANE - n
    # padded entries are zero in BOTH inputs -> contribute (0-0)^2 = 0
    a2 = jnp.pad(a, (0, pad)).reshape(rows, LANE)
    b2 = jnp.pad(b, (0, pad)).reshape(rows, LANE)
    blocks_per_core = rows // (NUM_CORES * block_rows)

    out = pl.pallas_call(
        _sqdiff_kernel,
        out_shape=jax.ShapeDtypeStruct((NUM_CORES * SUBLANE, LANE), jnp.float32),
        grid_spec=pltpu.PrefetchScalarGridSpec(
            num_scalar_prefetch=0,
            grid=(NUM_CORES, blocks_per_core),
            in_specs=[
                pl.BlockSpec((block_rows, LANE),
                             lambda c, i: (c * blocks_per_core + i, 0)),
                pl.BlockSpec((block_rows, LANE),
                             lambda c, i: (c * blocks_per_core + i, 0)),
            ],
            out_specs=pl.BlockSpec((SUBLANE, LANE), lambda c, i: (c, 0)),
            scratch_shapes=[pltpu.VMEM((block_rows, LANE), jnp.float32)],
        ),
        compiler_params=pltpu.CompilerParams(
            dimension_semantics=("parallel", "arbitrary"),
        ),
    )(a2, b2)
    # Only entries [c*SUBLANE, 0] are non-zero; summing the tiny (16,128) slab
    # combines the per-core partials.
    return jnp.sum(out)


def dist_l2_loss(params_a, params_b):
    """Pallas implementation of DistL2Loss.forward(modelb)."""
    assert len(params_a) == len(params_b)
    num_params = 0
    total = jnp.float32(0.0)
    for pa, pb in zip(params_a, params_b):
        assert pa.shape == pb.shape, "models must have identical parameter shapes"
        num_params += pa.size
        total = total + _sqdiff_sum_pallas(pa, pb)
    # divide by the UNPADDED total parameter count (matches num_params in torch)
    return total / jnp.float32(num_params)


def _make_params(key):
    """Deterministic synthetic model parameters (tiny conv + linear net).

    Shapes mimic a small CNN: conv weight OIHW (4,4,3,3), conv bias (4,),
    fc weight (8, 4*16*16), fc bias (8,).
    """
    k1, k2, k3, k4 = jax.random.split(key, 4)
    return [
        jax.random.normal(k1, (4, 4, 3, 3), dtype=jnp.float32),
        jax.random.normal(k2, (4,), dtype=jnp.float32),
        jax.random.normal(k3, (8, 4 * 16 * 16), dtype=jnp.float32) * 0.1,
        jax.random.normal(k4, (8,), dtype=jnp.float32),
    ]


if __name__ == "__main__":
    key = jax.random.PRNGKey(0)
    ka, kb = jax.random.split(key)
    params_a = _make_params(ka)   # "modela" (frozen reference model)
    params_b = _make_params(kb)   # "modelb" passed to forward()

    loss = dist_l2_loss(params_a, params_b)
    loss = jax.block_until_ready(loss)

    # sanity check against a pure-JAX reference
    num_params = sum(p.size for p in params_a)
    ref = sum(jnp.sum((p1 - p2) ** 2) for p1, p2 in zip(params_a, params_b))
    ref = ref / num_params
    assert jnp.allclose(loss, ref, rtol=1e-5, atol=1e-6), (loss, ref)

    print("KERNEL_OK")
</pallas_src>

<mosaic_0001>
module attributes {stable_mosaic.version = 11 : i64} {
  func.func @_sqdiff_kernel(%arg0: i32, %arg1: i32, %arg2: memref<8x128xf32, #tpu.memory_space<vmem>>, %arg3: memref<8x128xf32, #tpu.memory_space<vmem>>, %arg4: memref<8x128xf32, #tpu.memory_space<vmem>>, %arg5: memref<8x128xf32, #tpu.memory_space<vmem>>) attributes {dimension_semantics = [#tpu.dimension_semantics<parallel>, #tpu.dimension_semantics<arbitrary>], iteration_bounds = array<i64: 2, 1>, scalar_prefetch = 0 : i64, scratch_operands = 1 : i64, tpu.core_type = #tpu.core_type<tc>, window_params = [{transform_indices = @transform_0, window_bounds = array<i64: 8, 128>}, {transform_indices = @transform_1, window_bounds = array<i64: 8, 128>}, {transform_indices = @transform_2, window_bounds = array<i64: 8, 128>}]} {
    %c0_i32 = arith.constant 0 : i32
    %0 = arith.cmpi eq, %arg1, %c0_i32 : i32
    %1 = arith.extui %0 : i1 to i32
    %c0_i32_0 = arith.constant 0 : i32
    %2 = arith.cmpi ne, %1, %c0_i32_0 : i32
    scf.if %2 {
      %cst = arith.constant 0.000000e+00 : f32
      %13 = vector.broadcast %cst : f32 to vector<8x128xf32>
      %c0_10 = arith.constant 0 : index
      %c0_11 = arith.constant 0 : index
      %14 = vector.load %arg5[%c0_10, %c0_11] : memref<8x128xf32, #tpu.memory_space<vmem>>, vector<8x128xf32>
      tpu.vector_store %arg5[%c0_10, %c0_11], %13 {strides = array<i32>} : memref<8x128xf32, #tpu.memory_space<vmem>>, vector<8x128xf32>,
    } else {
    }
    %c0 = arith.constant 0 : index
    %c0_1 = arith.constant 0 : index
    %3 = vector.load %arg2[%c0, %c0_1] : memref<8x128xf32, #tpu.memory_space<vmem>>, vector<8x128xf32>
    %c0_2 = arith.constant 0 : index
    %c0_3 = arith.constant 0 : index
    %4 = vector.load %arg3[%c0_2, %c0_3] : memref<8x128xf32, #tpu.memory_space<vmem>>, vector<8x128xf32>
    %5 = arith.subf %3, %4 : vector<8x128xf32>
    %c0_4 = arith.constant 0 : index
    %c0_5 = arith.constant 0 : index
    %6 = vector.load %arg5[%c0_4, %c0_5] : memref<8x128xf32, #tpu.memory_space<vmem>>, vector<8x128xf32>
    %7 = arith.mulf %5, %5 : vector<8x128xf32>
    %8 = arith.addf %6, %7 : vector<8x128xf32>
    %c0_6 = arith.constant 0 : index
    %c0_7 = arith.constant 0 : index
    %9 = vector.load %arg5[%c0_6, %c0_7] : memref<8x128xf32, #tpu.memory_space<vmem>>, vector<8x128xf32>
    tpu.vector_store %arg5[%c0_6, %c0_7], %8 {strides = array<i32>} : memref<8x128xf32, #tpu.memory_space<vmem>>, vector<8x128xf32>,
    %c0_i32_8 = arith.constant 0 : i32
    %10 = arith.cmpi eq, %arg1, %c0_i32_8 : i32
    %11 = arith.extui %10 : i1 to i32
    %c0_i32_9 = arith.constant 0 : i32
    %12 = arith.cmpi ne, %11, %c0_i32_9 : i32
    scf.if %12 {
      %c0_10 = arith.constant 0 : index
      %c0_11 = arith.constant 0 : index
      %13 = vector.load %arg5[%c0_10, %c0_11] : memref<8x128xf32, #tpu.memory_space<vmem>>, vector<8x128xf32>
      %14 = vector.shape_cast %13 : vector<8x128xf32> to vector<1x8x128xf32>
      %cst = arith.constant dense<0.000000e+00> : vector<1xf32>
      %15 = vector.multi_reduction <add>, %14, %cst [1, 2] : vector<1x8x128xf32> to vector<1xf32>
      %16 = vector.shape_cast %15 : vector<1xf32> to vector<1x1x1xf32>
      %17 = vector.extract %16[0, 0, 0] : f32 from vector<1x1x1xf32>
      %18 = tpu.iota {dimensions = array<i32: 0>} : vector<8x128xi32>
      %19 = tpu.iota {dimensions = array<i32: 1>} : vector<8x128xi32>
      %c0_i32_12 = arith.constant 0 : i32
      %20 = vector.broadcast %c0_i32_12 : i32 to vector<8x128xi32>
      %21 = arith.cmpi eq, %18, %20 : vector<8x128xi32>
      %c0_i32_13 = arith.constant 0 : i32
      %22 = vector.broadcast %c0_i32_13 : i32 to vector<8x128xi32>
      %23 = arith.cmpi eq, %19, %22 : vector<8x128xi32>
      %24 = arith.andi %21, %23 : vector<8x128xi1>
      %cst_14 = arith.constant 0.000000e+00 : f32
      %25 = vector.broadcast %17 : f32 to vector<8x128xf32>
      %26 = vector.broadcast %cst_14 : f32 to vector<8x128xf32>
      %27 = arith.select %24, %25, %26 : vector<8x128xi1>, vector<8x128xf32>
      %c0_15 = arith.constant 0 : index
      %c0_16 = arith.constant 0 : index
      %28 = vector.load %arg4[%c0_15, %c0_16] : memref<8x128xf32, #tpu.memory_space<vmem>>, vector<8x128xf32>
      tpu.vector_store %arg4[%c0_15, %c0_16], %27 {strides = array<i32>} : memref<8x128xf32, #tpu.memory_space<vmem>>, vector<8x128xf32>,
    } else {
    }
    return
  }
  func.func @transform_0(%arg0: i32, %arg1: i32) -> (i32, i32) {
    %c1_i32 = arith.constant 1 : i32
    %0 = arith.muli %arg0, %c1_i32 : i32
    %1 = arith.addi %0, %arg1 : i32
    %c0_i32 = arith.constant 0 : i32
    %c0_i32_0 = arith.constant 0 : i32
    return %1, %c0_i32 : i32, i32
  }
  func.func @transform_1(%arg0: i32, %arg1: i32) -> (i32, i32) {
    %c1_i32 = arith.constant 1 : i32
    %0 = arith.muli %arg0, %c1_i32 : i32
    %1 = arith.addi %0, %arg1 : i32
    %c0_i32 = arith.constant 0 : i32
    %c0_i32_0 = arith.constant 0 : i32
    return %1, %c0_i32 : i32, i32
  }
  func.func @transform_2(%arg0: i32, %arg1: i32) -> (i32, i32) {
    %c0_i32 = arith.constant 0 : i32
    %c0_i32_0 = arith.constant 0 : i32
    return %arg0, %c0_i32 : i32, i32
  }
}

</mosaic_0001>

<bundles_post_ra>
// kernel: tpu_custom_call.1
= control target key start
LH: loop header
LB: loop body
LE: loop exit
PB: predicated region body
PF: predicated region fallthrough
CT: control target
= control target key end

     0   :  { %7 = vsyncpa [#allocation4], 0  ;;  %s755_s0 = inlined_call_operand.hbm [shape: f32[16,128], index: 0, kind: input, shape index: {}]   ;;  %s756_s1 = inlined_call_operand.hbm [shape: f32[16,128], index: 1, kind: input, shape index: {}]   ;;  %s757_s2 = inlined_call_operand.hbm [shape: f32[16,128], index: 2, kind: output, shape index: {}]  }
   0x1   :  { %9 = vsyncpa [#allocation4 + $0x1], 0 }
   0x2   :  { %10 = vsyncpa [#allocation7], 0 }
   0x3   :  { %12 = vsyncpa [#allocation7 + $0x1], 0 }
   0x4   :  { %13 = vsyncpa [#allocation5], 0 }
   0x5   :  { %15 = vsyncpa [#allocation5 + $0x1], 0  ;;  %s622_s9 = smov 0   ;;  %s624_s10 = smov 0  }
   0x6   :  { %s626_s11 = smov 0   ;;  %s628_s12 = smov 0  }
   0x7   :  { %s630_s13 = smov 0   ;;  %s632_s14 = smov 0  }
   0x8 LB: > { %s374_s15 = sadd.s32 4294967295, %s605_s14   ;;  %s375_s16 = sadd.s32 4294967294, %s605_s14   ;;  %s605_s14 = sphi %s632_s14, %s21_s14   ;;  %s601_s13 = sphi %s630_s13, %s766_s13   ;;  %s597_s12 = sphi %s628_s12, %s765_s12   ;;  %s593_s11 = sphi %s626_s11, %s764_s11   ;;  %s589_s10 = sphi %s624_s10, %s763_s10   ;;  %s585_s9 = sphi %s622_s9, %s762_s9  }
   0x9   : > { %s33_s17 = sadd.s32 1, %s601_s13  ;;  %s42_s18 = sadd.s32 1, %s593_s11 }
   0xa   : > { %p35_p0 = scmp.ge.s32.totalorder %s33_s17, 2  ;;  %p49_p1 = scmp.ne.s32.totalorder %s593_s11, %s589_s10 }
   0xb   : > { %p50_p2 = scmp.eq.s32.totalorder %s605_s14, 0  ;;  %p55_p3 = scmp.ne.s32.totalorder %s589_s10, %s585_s9 }
   0xc   : > { %s768_s17 = smov (%p35_p0, %s33_s17), 0  ;;  %p56_p5 = scmp.eq.s32.totalorder %s374_s15, 0 }
   0xd   : > { %p663_p4 = por %p50_p2, %p49_p1  ;;  %s39_s20 = ssub.s32 %s601_s13, %s768_s17 }
   0xe   : > { %p107_p6 = scmp.eq.s32.totalorder %s374_s15, 1  ;;  %p40_p7 = scmp.eq.s32.totalorder %s39_s20, 0 }
   0xf   : > { %p669_p8 = por %p56_p5, %p55_p3  ;;  %p113_p10 = scmp.eq.s32.totalorder %s375_s16, 1 }
  0x10   : > { %p673_p9 = por %p107_p6, %p49_p1  ;;  %p377_p12 = scmp.ge.s32.totalorder %s605_s14, 2 }
  0x11   : > { %s678_s23 = scalar_select %p40_p7, %s593_s11, %s42_s18  }
  0x12   : > { %p680_p11 = por %p113_p10, %p55_p3  ;;  %p409_p13 = scmp.lt.s32.totalorder %s605_s14, 2 }
  0x13   : > { %s133_s25 = sand.u32 1, %s593_s11   ;;  %s379_s27 = sshll.u32 %s601_s13, 3 }
  0x14   : > { %s378_s26 = sshll.u32 %s133_s25, 3  ;;  %s142_s30 = scalar_lea.hbm %s755_s0, %s379_s27 }
  0x15   : > { %s137_s3 = scalar_lea.vmem [#allocation3], %s378_s26  ;;  %s144_s5 = sshll.u32 %s142_s30, 4  ;;  %s145_s5 = int_to_ptr.hbm [resolvable:$true] %s144_s5 }
  0x16   : > { %s146_s4 = sshll.u32 %s137_s3, 4  ;;  %p399_p0 = pnand %p409_p13, %p663_p4  ;;  %s147_s4 = int_to_ptr.vmem [resolvable:$true] %s146_s4 }
  0x17   : > { %p382_p1 = scmp.ge.s32.totalorder %s605_s14, 1  ;;  %p171_p2 = scmp.lt.s32.totalorder %s605_s14, 3 }
  0x18   : > { %s134_s6 = scalar_lea.sflag [#allocation4], %s133_s25  ;;  %s162_s15 = scalar_lea.hbm %s756_s1, %s379_s27 }
  0x19   : > { %401 = dma.hbm_to_vmem [thread:$0]  (!%p399_p0), %s145_s5, 128, %s147_s4, %s134_s6  }
  0x1a   : > { %p172_p3 = pnand %p382_p1, %p171_p2  ;;  %s157_s16 = scalar_lea.vmem [#allocation6], %s378_s26 }
  0x1b   : > { %s166_s18 = sshll.u32 %s157_s16, 4  ;;  %s164_s20 = sshll.u32 %s162_s15, 4  ;;  %s167_s18 = int_to_ptr.vmem [resolvable:$true] %s166_s18  ;;  %s165_s20 = int_to_ptr.hbm [resolvable:$true] %s164_s20 }
  0x1c   : > { %s154_s28 = scalar_lea.sflag [#allocation7], %s133_s25  ;;  %175 = sbr.rel (%p172_p3) target bundleno = 224 (0xe0), region = 28 }
  0x1d   : > { %404 = dma.hbm_to_vmem [thread:$0]  (!%p399_p0), %s165_s20, 128, %s167_s18, %s154_s28  }
  0x1e   : > { %s699_s19 = sand.u32 (!%p172_p3), 1, %s589_s10  }
  0x1f   : > { %s702_s29 = sshll.u32 (!%p172_p3), %s699_s19, 3  ;;  %s178_s30 = scalar_lea.sflag (!%p172_p3), [#allocation4], %s699_s19 }
  0x20   : > { %s181_s3 = scalar_lea.vmem (!%p172_p3), [#allocation3], %s702_s29 }
  0x21   : > { %572 = dma.done.wait (%p669_p8), %s178_s30, 128  }
  0x22   : > { %574 = vsyncadd (%p669_p8), %s178_s30, 4294967168  ;;  %s188_s25 = scalar_lea.sflag [#allocation7], %s699_s19  ;;  %s191_s26 = scalar_lea.vmem [#allocation6], %s702_s29 }
  0x23   : > { %576 = dma.done.wait (%p669_p8), %s188_s25, 128  }
  0x24   : > { %578 = vsyncadd (%p669_p8), %s188_s25, 4294967168  ;;  %v225_v0 = vld [vmem:[%s181_s3] sm:$0xff]  ;;  %v226_v1 = vld [vmem:[%s191_s26] sm:$0xff]  ;;  %v245_v11 = vlaneseq  ;;  %s387_s21 = sshll.u32 %s597_s12, 3  ;;  %s217_s6 = scalar_lea.vmem [#allocation8], %s702_s29 }
  0x25   : > { %v227_v2 = vsub.f32 %v225_v0, %v226_v1  ;;  %s266_s5 = scalar_lea.hbm %s757_s2, %s387_s21  ;;  %s268_s7 = sshll.u32 %s217_s6, 4  ;;  %s269_s7 = int_to_ptr.vmem [resolvable:$true] %s268_s7 }
  0x26   : > { %v246_v12 = vshrl.u32 %v245_v11, 7  ;;  %v248_v13 = vand.u32 127, %v245_v11  ;;  %s270_s8 = sshll.u32 %s266_s5, 4  ;;  %s256_s16 = scalar_lea.sflag [#allocation5], %s699_s19  ;;  %s271_s8 = int_to_ptr.hbm [resolvable:$true] %s270_s8 }
  0x27   : > { %v229_v3 = vmul.f32 %v227_v2, %v227_v2  ;;  %s533_s18 = sshra.s32 %s271_s8, 4  ;;  %s539_s29 = scalar_lea.hbm %s757_s2, 16  ;;  %s534_s18 = int_to_ptr.hbm [resolvable:$true] %s533_s18 }
  0x28   : > { %vm249_vm0 = vcmp.eq.s32.totalorder %v246_v12, 0  ;;  %vm250_vm1 = vcmp.eq.s32.totalorder %v248_v13, 0  ;;  %s535_s12 = scalar_lea.hbm %s534_s18, 8  ;;  %p540_p7 = scmp.lt.s32.totalorder %s534_s18, %s757_s2 }
  0x29   : > { %236 = vadd.xlane.f32.xlu0 %v229_v3  ;;  %vm251_vm2 = vmand %vm249_vm0, %vm250_vm1  ;;  %p536_p4 = scmp.ne.s32.totalorder %s534_s18, %s535_s12  ;;  %p541_p8 = scmp.lt.s32.totalorder %s539_s29, %s535_s12 }
  0x2b   : > { %p537_p5 = pnand %p536_p4, %p673_p9  ;;  %p542_p10 = por %p541_p8, %p540_p7 }
  0x2d   : > { %p538_p6 = pneg %p537_p5 }
  0x2f   : > { %p543_p13 = pnand %p542_p10, %p538_p6 }
  0x9c   : > { %v237_v4 = vpop.xlane.xlu0 %236 }
  0x9d   : > { %v238_v5 = vrot.slane %v237_v4, 4 }
  0x9f   : > { %v239_v6 = vadd.f32 %v238_v5, %v237_v4 }
  0xa1   : > { %v240_v7 = vrot.slane %v239_v6, 2 }
  0xa3   : > { %v241_v8 = vadd.f32 %v240_v7, %v239_v6 }
  0xa5   : > { %v242_v9 = vrot.slane %v241_v8, 1 }
  0xa7   : > { %v243_v10 = vadd.f32 %v242_v9, %v241_v8 }
  0xa9   : > { %390 = vpush %v243_v10 }
  0xda   : > { %s391_s15 = spop %390 }
  0xdb   : > { %v252_v14 = vstv %s391_s15 }
  0xdc   : > { %v253_v15 = vsel %vm251_vm2, %v252_v14, 0.0 }
  0xdd   : > { %254 = vst [vmem:[%s217_s6] sm:$0xff] %v253_v15 }
  0xde   : > { %546 = shalt.err (!%p543_p13)
}
  0xdf   : > { %396 = dma.vmem_to_hbm [thread:$0]  (%p673_p9), %s269_s7, 128, %s271_s8, %s256_s16  }
  0xe0 PF: > { %s282_s19 = sand.u32 1, %s585_s9   ;;  %p406_p0 = pnand %p377_p12, %p680_p11 }
  0xe1   : > { %s283_s25 = scalar_lea.sflag [#allocation5], %s282_s19 }
  0xe2   : > { %p407_p1 = pneg %p406_p0 }
  0xe4   : > { %580 = dma.done.wait (%p407_p1), %s283_s25, 128  }
  0xe5   : > { %582 = vsyncadd (%p407_p1), %s283_s25, 4294967168  ;;  %s21_s14 = sadd.s32 1, %s605_s14   ;;  %s762_s9 = smov %s589_s10 }
  0xe6   : > { %p18_p2 = scmp.ge.s32.totalorder %s21_s14, 4   ;;  %s763_s10 = smov %s593_s11 }
  0xe7   : > { %s764_s11 = smov %s678_s23  ;;  %s765_s12 = smov %s601_s13 }
  0xe8   : > { %s766_s13 = smov %s768_s17  ;;  %20 = sbr.rel (!%p18_p2) target bundleno = 8 (0x8), region = 94 }
  0xed   :  { %289 = vsyncpa [#allocation4], 1 }
  0xee   :  { %291 = vsyncpa [#allocation4 + $0x1], 1 }
  0xef   :  { %292 = vsyncpa [#allocation7], 1 }
  0xf0   :  { %294 = vsyncpa [#allocation7 + $0x1], 1 }
  0xf1   :  { %295 = vsyncpa [#allocation5], 1 }
  0xf2   :  { %297 = vsyncpa [#allocation5 + $0x1], 1 }

</bundles_post_ra>
